<compile_context>
chip_gen: v6e
topology: v6e:2x2x1
jax: 0.10.0
libtpu: 0.0.40
codegen_flags: <defaults>
</compile_context>

<pallas_src>
import jax
import jax.numpy as jnp
from jax.experimental import pallas as pl
from jax.experimental.pallas import tpu as pltpu

_LANES = 128  # vreg lane width; slab is padded to a multiple of this.


def _passthrough_kernel(slab_ref, out_ref):
    # Output HBM buffer aliases the input (input_output_aliases={0: 0});
    # this single-vreg VMEM copy is the entire forward pass.
    out_ref[...] = slab_ref[...]


def channel_split_forward(params_in, params_out):
    """Pallas equivalent of ChannelSplit.forward().

    Args:
      params_in:  jnp array of shape (1, 1, c_in, 1, 1)
      params_out: jnp array of shape (1, c_out, 1, 1, 1)
    Returns:
      {'in': params_in, 'out': params_out} with identical shapes/dtypes.
    """
    assert params_in.dtype == params_out.dtype, "parameters share one dtype"
    dtype = params_in.dtype
    c_in = params_in.shape[2]
    c_out = params_out.shape[1]

    # Fuse both parameters into one lane-dense slab (1, padded), padded to a
    # multiple of 128 lanes -> one DMA pair, unmasked store inside the kernel.
    total = c_in + c_out
    padded = max(_LANES, pl.cdiv(total, _LANES) * _LANES)
    slab = jnp.zeros((1, padded), dtype=dtype)
    slab = slab.at[0, :c_in].set(params_in.reshape(c_in))
    slab = slab.at[0, c_in:total].set(params_out.reshape(c_out))

    out_slab = pl.pallas_call(
        _passthrough_kernel,
        out_shape=jax.ShapeDtypeStruct((1, padded), dtype),
        # Gridless: block == full array, so the (8,128) divisibility rule is
        # satisfied trivially and no pipeline steps are emitted.
        in_specs=[
            pl.BlockSpec((1, padded), lambda: (0, 0),
                         memory_space=pltpu.MemorySpace.VMEM),
        ],
        out_specs=pl.BlockSpec((1, padded), lambda: (0, 0),
                               memory_space=pltpu.MemorySpace.VMEM),
        # Output aliases the (temporary) slab input buffer: no fresh HBM
        # output allocation for this pass-through.
        input_output_aliases={0: 0},
    )(slab)

    return {
        'in': out_slab[0, :c_in].reshape(1, 1, c_in, 1, 1),
        'out': out_slab[0, c_in:total].reshape(1, c_out, 1, 1, 1),
    }


if __name__ == "__main__":
    # conv_dimension = (c_in, c_out)
    c_in, c_out = 4, 8

    # PyTorch __init__ zero-initializes both parameters; to make the
    # pass-through verifiable we fill them with deterministic values from
    # PRNGKey(0) (shapes match the module exactly).
    key = jax.random.PRNGKey(0)
    k_in, k_out = jax.random.split(key)
    params_in = jax.random.normal(k_in, (1, 1, c_in, 1, 1), dtype=jnp.float32)
    params_out = jax.random.normal(k_out, (1, c_out, 1, 1, 1), dtype=jnp.float32)

    result = channel_split_forward(params_in, params_out)
    jax.block_until_ready(result)

    assert result['in'].shape == (1, 1, c_in, 1, 1)
    assert result['out'].shape == (1, c_out, 1, 1, 1)
    assert result['in'].dtype == params_in.dtype
    assert result['out'].dtype == params_out.dtype
    assert jnp.allclose(result['in'], params_in)
    assert jnp.allclose(result['out'], params_out)

    print("KERNEL_OK")
</pallas_src>

<mosaic_0001>
module attributes {stable_mosaic.version = 11 : i64} {
  func.func @_passthrough_kernel(%arg0: memref<1x128xf32, #tpu.memory_space<vmem>>, %arg1: memref<1x128xf32, #tpu.memory_space<vmem>>) attributes {dimension_semantics = [], scalar_prefetch = 0 : i64, scratch_operands = 0 : i64, tpu.core_type = #tpu.core_type<tc>} {
    %c0 = arith.constant 0 : index
    %c0_0 = arith.constant 0 : index
    %0 = vector.load %arg0[%c0, %c0_0] : memref<1x128xf32, #tpu.memory_space<vmem>>, vector<1x128xf32>
    %c0_1 = arith.constant 0 : index
    %c0_2 = arith.constant 0 : index
    %1 = vector.load %arg1[%c0_1, %c0_2] : memref<1x128xf32, #tpu.memory_space<vmem>>, vector<1x128xf32>
    tpu.vector_store %arg1[%c0_1, %c0_2], %0 {strides = array<i32>} : memref<1x128xf32, #tpu.memory_space<vmem>>, vector<1x128xf32>,
    return
  }
}

</mosaic_0001>

<bundles_post_ra>
// kernel: tpu_custom_call.1
= control target key start
LH: loop header
LB: loop body
LE: loop exit
PB: predicated region body
PF: predicated region fallthrough
CT: control target
= control target key end

     0   :  { %6 = vsyncpa [#allocation3], 0  ;;  %s102_s0 = inlined_call_operand.hbm [shape: f32[1,128], index: 0, kind: input, shape index: {}, may-alias: {0,1}]   ;;  %s103_s1 = inlined_call_operand.hbm [shape: f32[1,128], index: 1, kind: output, shape index: {}, may-alias: {0,1}]  }
   0x1   :  { %7 = vsyncpa [#allocation4], 0  ;;  %s84_s6 = smov [#allocation2]  }
   0x2   :  { %s14_s7 = sshll.u32 %s84_s6, 4  ;;  %s15_s7 = int_to_ptr.vmem [resolvable:$true] %s14_s7 }
   0x3   :  { %s48_s8 = scalar_lea.vmem %s15_s7, 16  ;;  %s52_s9 = scalar_lea.vmem %s15_s7, 32 }
   0x4   :  { %p49_p0 = scmp.ne.s32.totalorder %s15_s7, %s48_s8  ;;  %p53_p1 = scmp.lt.s32.totalorder %s15_s7, %s15_s7 }
   0x5   :  { %p54_p2 = scmp.lt.s32.totalorder %s52_s9, %s48_s8 }
   0x7   :  { %p55_p3 = por %p54_p2, %p53_p1 }
   0x9   :  { %p56_p4 = pnand %p55_p3, %p49_p0 }
   0xb   :  { %59 = shalt.err (!%p56_p4)
}
   0xc   :  { %17 = dma.hbm_to_vmem [thread:$0]  %s102_s0, 16, %s15_s7, [#allocation3]  }
   0xd   :  { %80 = dma.done.wait [#allocation3], 16  }
   0xe   :  { %81 = vsyncadd [#allocation3], 4294967280  ;;  %s85_s12 = smov [#allocation5]   ;;  %v21_v0 = vld [vmem:[#allocation2] sm:$0x1] }
   0xf   :  { %s29_s13 = sshll.u32 %s85_s12, 4  ;;  %22 = vst [vmem:[#allocation5] sm:$0x1] %v21_v0  ;;  %s30_s13 = int_to_ptr.vmem [resolvable:$true] %s29_s13 }
  0x10   :  { %s60_s14 = scalar_lea.vmem %s30_s13, 16  ;;  %s64_s15 = scalar_lea.vmem %s30_s13, 32 }
  0x11   :  { %p61_p5 = scmp.ne.s32.totalorder %s30_s13, %s60_s14  ;;  %p65_p6 = scmp.lt.s32.totalorder %s30_s13, %s30_s13 }
  0x12   :  { %p66_p7 = scmp.lt.s32.totalorder %s64_s15, %s60_s14 }
  0x14   :  { %p67_p8 = por %p66_p7, %p65_p6 }
  0x16   :  { %p68_p9 = pnand %p67_p8, %p61_p5 }
  0x18   :  { %71 = shalt.err (!%p68_p9)
}
  0x19   :  { %32 = dma.vmem_to_hbm [thread:$0]  %s30_s13, 16, %s103_s1, [#allocation4]  }
  0x1a   :  { %82 = dma.done.wait [#allocation4], 16  }
  0x1b   :  { %83 = vsyncadd [#allocation4], 4294967280 }
  0x1c   :  { %36 = vsyncpa [#allocation3], 1 }
  0x1d   :  { %37 = vsyncpa [#allocation4], 1 }

</bundles_post_ra>
